<compile_context>
chip_gen: v6e
topology: v6e:2x2x1
jax: 0.10.0
libtpu: 0.0.40
codegen_flags: <defaults>
</compile_context>

<pallas_src>
import functools

import jax
import jax.numpy as jnp
from jax.experimental import pallas as pl
from jax.experimental.pallas import tpu as pltpu


def _pe_xyz_kernel(x_ref, c_ref, o_ref, *, exact_cos):
    # x_ref: (TN, 3) f32
    # c_ref: (8, 6H) f32  rows: 0=fx, 1=fy, 2=fz, 3=phase-offset(pi/2 on cos cols),
    #                           4=cos-mask, 5..7=padding
    # o_ref: (TN, 6H) f32
    x = x_ref[...]
    # Masked per-coordinate frequency rows: exactly one of fx/fy/fz is nonzero
    # per column, so this sum reproduces the reference f32 product bit-exactly.
    phase = (x[:, 0:1] * c_ref[0:1, :]
             + x[:, 1:2] * c_ref[1:2, :]
             + x[:, 2:3] * c_ref[2:3, :])
    if exact_cos:
        # Bit-parity path with the PyTorch formulation (2 transcendentals/elem).
        is_cos = c_ref[4:5, :] > 0.5
        o_ref[...] = jnp.where(is_cos, jnp.cos(phase), jnp.sin(phase))
    else:
        # Fast path: fold the pi/2 offset, single sin over the whole slab.
        o_ref[...] = jnp.sin(phase + c_ref[3:4, :])


def _choose_tile_n(n, h6, vmem_budget_bytes):
    """Largest row tile that double-buffers within a conservative VMEM budget."""
    padded_h6 = ((h6 + 127) // 128) * 128
    # Per-row VMEM: 2x output double-buffer + ~4 live (tn, padded_h6) f32
    # temporaries + 2x lane-padded (tn, 128) x double-buffer.
    bytes_per_row = (2 + 4) * padded_h6 * 4 + 2 * 128 * 4
    tn = max(8, vmem_budget_bytes // bytes_per_row)
    tn = min(int(tn), 4096)
    tn = (tn // 8) * 8
    if n <= tn:
        if n >= 16:
            # Split into >= 2 blocks so both v7x TensorCores get work
            # (harmless on single-TC v5e/v6e).
            half = (((n + 1) // 2) + 7) // 8 * 8
            tn = min(tn, max(8, half))
        else:
            tn = n  # tiny N: single full-extent block (allowed even if not %8)
    return tn


def positional_encoding_xyz(x, hidden_dim, *, exact_cos=False, tile_n=None,
                            vmem_budget_bytes=8 << 20):
    """x: (N, 3) float32 -> (N, 6*hidden_dim) float32."""
    x = x.astype(jnp.float32)
    n, c = x.shape
    assert c == 3, "expected xyz input of shape (N, 3)"
    h = int(hidden_dim)
    h6 = 6 * h

    # Per-column constants (all metadata hoisted out of the kernel).
    n2pi = jnp.power(2.0, jnp.arange(h, dtype=jnp.float32)) * jnp.pi      # (H,)
    col = jnp.arange(h6, dtype=jnp.int32)
    coord = col // (2 * h)                      # 0 -> x, 1 -> y, 2 -> z
    is_cos = (col % (2 * h)) >= h               # second half of each 2H slab
    freq_row = jnp.tile(n2pi, 6)                # (6H,)
    zero = jnp.zeros((), jnp.float32)
    consts = jnp.zeros((8, h6), jnp.float32)
    consts = consts.at[0].set(jnp.where(coord == 0, freq_row, zero))      # fx
    consts = consts.at[1].set(jnp.where(coord == 1, freq_row, zero))      # fy
    consts = consts.at[2].set(jnp.where(coord == 2, freq_row, zero))      # fz
    consts = consts.at[3].set(jnp.where(is_cos, jnp.float32(jnp.pi / 2), zero))
    consts = consts.at[4].set(is_cos.astype(jnp.float32))                 # cos mask

    # Row tiling.
    if tile_n is not None:
        tn = int(tile_n)
        tn = n if n <= tn else max(8, (tn // 8) * 8)
    else:
        tn = _choose_tile_n(n, h6, vmem_budget_bytes)
    grid = (pl.cdiv(n, tn),)

    return pl.pallas_call(
        functools.partial(_pe_xyz_kernel, exact_cos=exact_cos),
        out_shape=jax.ShapeDtypeStruct((n, h6), jnp.float32),
        grid=grid,
        in_specs=[
            pl.BlockSpec((tn, 3), lambda i: (i, 0)),
            pl.BlockSpec((8, h6), lambda i: (0, 0)),
        ],
        out_specs=pl.BlockSpec((tn, h6), lambda i: (i, 0)),
        compiler_params=pltpu.CompilerParams(
            dimension_semantics=("parallel",),
        ),
        cost_estimate=pl.CostEstimate(
            flops=7 * n * h6,
            transcendentals=n * h6,
            bytes_accessed=4 * (n * 3 + n * h6 + 8 * h6),
        ),
    )(x, consts)


def _reference(x, hidden_dim):
    h = int(hidden_dim)
    n2pi = jnp.power(2.0, jnp.arange(h, dtype=jnp.float32)) * jnp.pi
    px = x[:, 0:1] * n2pi
    py = x[:, 1:2] * n2pi
    pz = x[:, 2:3] * n2pi
    return jnp.concatenate(
        [jnp.sin(px), jnp.cos(px),
         jnp.sin(py), jnp.cos(py),
         jnp.sin(pz), jnp.cos(pz)],
        axis=-1,
    )


if __name__ == "__main__":
    hidden_dim = 8  # small H keeps sin(p + pi/2) within f32 tolerance of cos(p)
    key = jax.random.PRNGKey(0)
    k1, k2 = jax.random.split(key)

    # Case 1: tiny N (single full-extent block path).
    n1 = 12
    x1 = jax.random.uniform(k1, (n1, 3), dtype=jnp.float32, minval=-1.0, maxval=1.0)
    out1 = jax.block_until_ready(positional_encoding_xyz(x1, hidden_dim))
    ref1 = _reference(x1, hidden_dim)
    assert out1.shape == (n1, 6 * hidden_dim), out1.shape
    assert jnp.allclose(out1, ref1, atol=2e-4, rtol=2e-4), "mismatch (small)"

    # Case 2: forced small tile -> multi-step grid with ragged tail block.
    n2 = 40
    x2 = jax.random.uniform(k2, (n2, 3), dtype=jnp.float32, minval=-1.0, maxval=1.0)
    out2 = jax.block_until_ready(positional_encoding_xyz(x2, hidden_dim, tile_n=16))
    ref2 = _reference(x2, hidden_dim)
    assert out2.shape == (n2, 6 * hidden_dim), out2.shape
    assert jnp.allclose(out2, ref2, atol=2e-4, rtol=2e-4), "mismatch (tiled)"

    # Case 3: bit-parity exact-cos path with default budget-based tiling
    # (>= 2 grid steps chosen automatically for this N).
    out3 = jax.block_until_ready(
        positional_encoding_xyz(x2, hidden_dim, exact_cos=True))
    assert jnp.allclose(out3, ref2, atol=1e-4, rtol=1e-4), "mismatch (exact)"

    print("KERNEL_OK")
</pallas_src>

<mosaic_0001>
module attributes {stable_mosaic.version = 11 : i64} {
  func.func @_pe_xyz_kernel(%arg0: i32, %arg1: memref<12x3xf32, #tpu.memory_space<vmem>>, %arg2: memref<8x48xf32, #tpu.memory_space<vmem>>, %arg3: memref<12x48xf32, #tpu.memory_space<vmem>>) attributes {dimension_semantics = [#tpu.dimension_semantics<parallel>], iteration_bounds = array<i64: 1>, scalar_prefetch = 0 : i64, scratch_operands = 0 : i64, tpu.core_type = #tpu.core_type<tc>, window_params = [{transform_indices = @transform_0, window_bounds = array<i64: 12, 3>}, {pipeline_mode = #tpu.pipeline_mode<synchronous>, transform_indices = @transform_1, window_bounds = array<i64: 8, 48>}, {transform_indices = @transform_2, window_bounds = array<i64: 12, 48>}]} {
    %c0 = arith.constant 0 : index
    %c0_0 = arith.constant 0 : index
    %0 = vector.load %arg1[%c0, %c0_0] : memref<12x3xf32, #tpu.memory_space<vmem>>, vector<12x3xf32>
    %1 = vector.extract_strided_slice %0 {offsets = [0, 0], sizes = [12, 1], strides = [1, 1]} : vector<12x3xf32> to vector<12x1xf32>
    %c0_1 = arith.constant 0 : index
    %c0_2 = arith.constant 0 : index
    %2 = vector.load %arg2[%c0_1, %c0_2] : memref<8x48xf32, #tpu.memory_space<vmem>>, vector<1x48xf32>
    %3 = vector.broadcast %1 : vector<12x1xf32> to vector<12x48xf32>
    %4 = vector.broadcast %2 : vector<1x48xf32> to vector<12x48xf32>
    %5 = arith.mulf %3, %4 : vector<12x48xf32>
    %6 = vector.extract_strided_slice %0 {offsets = [0, 1], sizes = [12, 1], strides = [1, 1]} : vector<12x3xf32> to vector<12x1xf32>
    %c1 = arith.constant 1 : index
    %c0_3 = arith.constant 0 : index
    %7 = vector.load %arg2[%c1, %c0_3] : memref<8x48xf32, #tpu.memory_space<vmem>>, vector<1x48xf32>
    %8 = vector.broadcast %6 : vector<12x1xf32> to vector<12x48xf32>
    %9 = vector.broadcast %7 : vector<1x48xf32> to vector<12x48xf32>
    %10 = arith.mulf %8, %9 : vector<12x48xf32>
    %11 = arith.addf %5, %10 : vector<12x48xf32>
    %12 = vector.extract_strided_slice %0 {offsets = [0, 2], sizes = [12, 1], strides = [1, 1]} : vector<12x3xf32> to vector<12x1xf32>
    %c2 = arith.constant 2 : index
    %c0_4 = arith.constant 0 : index
    %13 = vector.load %arg2[%c2, %c0_4] : memref<8x48xf32, #tpu.memory_space<vmem>>, vector<1x48xf32>
    %14 = vector.broadcast %12 : vector<12x1xf32> to vector<12x48xf32>
    %15 = vector.broadcast %13 : vector<1x48xf32> to vector<12x48xf32>
    %16 = arith.mulf %14, %15 : vector<12x48xf32>
    %17 = arith.addf %11, %16 : vector<12x48xf32>
    %c3 = arith.constant 3 : index
    %c0_5 = arith.constant 0 : index
    %18 = vector.load %arg2[%c3, %c0_5] : memref<8x48xf32, #tpu.memory_space<vmem>>, vector<1x48xf32>
    %19 = vector.broadcast %18 : vector<1x48xf32> to vector<12x48xf32>
    %20 = arith.addf %17, %19 : vector<12x48xf32>
    %21 = math.sin %20 : vector<12x48xf32>
    %c0_6 = arith.constant 0 : index
    %c0_7 = arith.constant 0 : index
    %22 = vector.load %arg3[%c0_6, %c0_7] : memref<12x48xf32, #tpu.memory_space<vmem>>, vector<12x48xf32>
    tpu.vector_store %arg3[%c0_6, %c0_7], %21 {strides = array<i32>} : memref<12x48xf32, #tpu.memory_space<vmem>>, vector<12x48xf32>,
    return
  }
  func.func @transform_0(%arg0: i32) -> (i32, i32) {
    %c0_i32 = arith.constant 0 : i32
    %c0_i32_0 = arith.constant 0 : i32
    return %arg0, %c0_i32 : i32, i32
  }
  func.func @transform_1(%arg0: i32) -> (i32, i32) {
    %c0_i32 = arith.constant 0 : i32
    %c0_i32_0 = arith.constant 0 : i32
    %c0_i32_1 = arith.constant 0 : i32
    return %c0_i32, %c0_i32_0 : i32, i32
  }
  func.func @transform_2(%arg0: i32) -> (i32, i32) {
    %c0_i32 = arith.constant 0 : i32
    %c0_i32_0 = arith.constant 0 : i32
    return %arg0, %c0_i32 : i32, i32
  }
}

</mosaic_0001>

<bundles_post_ra>
// kernel: tpu_custom_call.1
= control target key start
LH: loop header
LB: loop body
LE: loop exit
PB: predicated region body
PF: predicated region fallthrough
CT: control target
= control target key end

     0   :  { %v366_v1 = vmov 1   ;;  %v367_v2 = vmov 0   ;;  %s484_s0 = inlined_call_operand.vmem [shape: f32[12,3], index: 0, kind: input, shape index: {}]   ;;  %s485_s1 = inlined_call_operand.vmem [shape: f32[8,48], index: 1, kind: input, shape index: {}]   ;;  %s486_s2 = inlined_call_operand.hbm [shape: f32[12,48], index: 2, kind: output, shape index: {}]  }
   0x1   :  { %v12_v0 = vld [vmem:[%s484_s0] sm:$0xff]  ;;  %333 = vset.pattern.permute.xlu1 %v366_v1  ;;  %332 = vset.pattern.permute.xlu0 %v367_v2 }
   0x2   :  { %7 = vsyncpa [#allocation3], 0  ;;  %33 = vperm.xlu1 %333, %v12_v0   ;;  %17 = vperm.xlu0 %332, %v12_v0   ;;  %v13_v3 = vld [vmem:[%s484_s0 + $0x8] sm:$0xf]  ;;  %v368_v4 = vmov 2  }
   0x3   :  { %v301_v7 = vld [vmem:[%s485_s1 + $0x1] ss:$0 sm:$0xff]  ;;  %v300_v8 = vld [vmem:[%s485_s1] ss:$0 sm:$0xff]  ;;  %v302_v15 = vld [vmem:[%s485_s1 + $0x2] ss:$0 sm:$0xff] }
   0x4   :  { %v303_v22 = vld [vmem:[%s485_s1 + $0x3] ss:$0 sm:$0xff]  ;;  %v369_v47 = vmov 683565275   ;;  %v370_v51 = vmov 2475754826  }
   0x5   :  { %v371_v53 = vmov 2131351028   ;;  %v372_v55 = vmov 2102212464   ;;  %v373_v57 = vmov 920167782  }
   0x6   :  { %37 = vperm.xlu1 %333, %v13_v3   ;;  %22 = vperm.xlu0 %332, %v13_v3   ;;  %s375_s1 = smov [#allocation2]  }
   0x7   :  { %s289_s20 = sshll.u32 %s375_s1, 4  ;;  %s290_s20 = int_to_ptr.vmem [resolvable:$true] %s289_s20 }
   0x8   :  { %s344_s21 = scalar_lea.vmem %s290_s20, 256  ;;  %p349_p1 = scmp.lt.s32.totalorder %s290_s20, %s290_s20 }
   0x9   :  { %p345_p0 = scmp.ne.s32.totalorder %s290_s20, %s344_s21  ;;  %p350_p2 = scmp.lt.s32.totalorder %s344_s21, %s344_s21 }
   0xa   :  { %335 = vset.pattern.permute.xlu1 %v368_v4  ;;  %334 = vset.pattern.permute.xlu0 %v368_v4 }
   0xb   :  { %54 = vperm.xlu1 %335, %v13_v3   ;;  %50 = vperm.xlu0 %334, %v12_v0   ;;  %v374_v0 = vmov 1326507024   ;;  %p351_p3 = por %p350_p2, %p349_p1 }
   0xd   :  { %p352_p4 = pnand %p351_p3, %p345_p0 }
  0x7d   :  { %v34_v5 = vpop.permute.xlu1 %33  ;;  %v18_v6 = vpop.permute.xlu0 %17 }
  0x7e   :  { %v44_v11 = vmul.f32 %v301_v7, %v34_v5  ;;  %v29_v12 = vmul.f32 %v300_v8, %v18_v6 }
  0x80   :  { %v46_v18 = vadd.f32 %v44_v11, %v29_v12 }
  0x81   :  { %v38_v9 = vpop.permute.xlu1 %37  ;;  %v23_v10 = vpop.permute.xlu0 %22 }
  0x82   :  { %v45_v13 = vmul.f32 %v301_v7, %v38_v9  ;;  %v30_v14 = vmul.f32 %v300_v8, %v23_v10 }
  0x84   :  { %v47_v19 = vadd.f32 %v45_v13, %v30_v14 }
  0x86   :  { %v55_v16 = vpop.permute.xlu1 %54  ;;  %v51_v17 = vpop.permute.xlu0 %50 }
  0x87   :  { %v62_v20 = vmul.f32 %v302_v15, %v55_v16  ;;  %v61_v21 = vmul.f32 %v302_v15, %v51_v17 }
  0x89   :  { %v64_v23 = vadd.f32 %v62_v20, %v47_v19  ;;  %v63_v24 = vadd.f32 %v61_v21, %v46_v18 }
  0x8b   :  { %v411_v25 = vadd.f32 %v303_v22, %v64_v23  ;;  %v413_v26 = vadd.f32 %v303_v22, %v63_v24 }
  0x8d   :  { %v176_v27 = vand.u32 2147483647, %v411_v25  ;;  %v179_v28 = vand.u32 2139095040, %v411_v25  ;;  %v75_v29 = vand.u32 2139095040, %v413_v26  ;;  %v72_v32 = vand.u32 2147483647, %v413_v26 }
  0x8e   :  { %vm178_vm14 = vcmp.lt.s32.totalorder %v411_v25, 0 }
  0x8f   :  { %v180_v30 = vshrl.u32 %v179_v28, 23  ;;  %v183_v31 = vand.u32 8388607, %v176_v27  ;;  %v76_v33 = vshrl.u32 %v75_v29, 23  ;;  %v423_v38 = vand.u32 8388607, %v72_v32 }
  0x90   :  { %vm466_vm15 = vcmp.le.f32.partialorder %v176_v27, 0.7853982 }
  0x91   :  { %v308_v34 = vadd.s32 4294967169, %v180_v30  ;;  %v304_v35 = vadd.s32 4294967169, %v76_v33  ;;  %v184_v37 = vor.u32 8388608, %v183_v31  ;;  %v80_v45 = vor.u32 8388608, %v423_v38 }
  0x93   :  { %v186_v36 = vadd.s32 1, %v308_v34  ;;  %v82_v39 = vadd.s32 1, %v304_v35  ;;  %v425_v44 = vshll.u32 %v184_v37, 8 }
  0x95   :  { %vm187_vm0 = vcmp.gt.s32.totalorder %v186_v36, 0  ;;  %vm83_vm1 = vcmp.gt.s32.totalorder %v82_v39, 0 }
  0x96   :  { %v188_v40 = vsel %vm187_vm0, %v186_v36, 0  ;;  %v84_v43 = vsel %vm83_vm1, %v82_v39, 0  ;;  %v120_v39 = vshll.u32 %v80_v45, 8  ;;  %vm74_vm0 = vcmp.lt.s32.totalorder %v413_v26, 0 }
  0x97   :  { %v189_v41 = vshrl.u32 %v188_v40, 5  ;;  %v190_v42 = vand.u32 31, %v188_v40  ;;  %v428_v49 = vshrl.u32 %v84_v43, 5  ;;  %v86_v50 = vand.u32 31, %v84_v43 }
  0x98   :  { %vm73_vm1 = vcmp.le.f32.partialorder %v72_v32, 0.7853982 }
  0x99   :  { %v191_v46 = vsub.s32 32, %v190_v42  ;;  %v193_v48 = vshll.u32 %v369_v47, %v190_v42  ;;  %v196_v52 = vshll.u32 %v370_v51, %v190_v42  ;;  %v199_v54 = vshll.u32 %v371_v53, %v190_v42 }
  0x9a   :  { %v202_v56 = vshll.u32 %v372_v55, %v190_v42  ;;  %v205_v58 = vshll.u32 %v373_v57, %v190_v42  ;;  %vm208_vm2 = vcmp.lt.s32.totalorder %v189_v41, 1  ;;  %vm209_vm3 = vcmp.lt.s32.totalorder %v189_v41, 2 }
  0x9b   :  { %v194_v59 = vshrl.u32 %v370_v51, %v191_v46  ;;  %v197_v60 = vshrl.u32 %v371_v53, %v191_v46  ;;  %v200_v61 = vshrl.u32 %v372_v55, %v191_v46  ;;  %v192_v62 = vshrl.u32 %v369_v47, %v191_v46 }
  0x9c   :  { %v203_v63 = vshrl.u32 %v373_v57, %v191_v46  ;;  %v206_v1 = vshrl.u32 %v374_v0, %v191_v46  ;;  %v87_v5 = vsub.s32 32, %v86_v50  ;;  %vm210_vm4 = vcmp.lt.s32.totalorder %v189_v41, 3 }
  0x9d   :  { %v195_v2 = vor.u32 %v194_v59, %v193_v48  ;;  %v198_v3 = vor.u32 %v197_v60, %v196_v52  ;;  %v201_v4 = vor.u32 %v200_v61, %v199_v54  ;;  %vm211_vm5 = vcmp.lt.s32.totalorder %v189_v41, 4 }
  0x9e   :  { %v204_v6 = vor.u32 %v203_v63, %v202_v56  ;;  %v207_v7 = vor.u32 %v206_v1, %v205_v58  ;;  %v89_v15 = vshll.u32 %v369_v47, %v86_v50  ;;  %v90_v18 = vshrl.u32 %v370_v51, %v87_v5 }
  0x9f   :  { %v212_v8 = vsel %vm208_vm2, %v192_v62, %v195_v2  ;;  %v213_v9 = vsel %vm211_vm5, %v201_v4, 2102212464  ;;  %v216_v10 = vsel %vm208_vm2, %v195_v2, %v198_v3  ;;  %v220_v11 = vsel %vm208_vm2, %v198_v3, %v201_v4 }
  0xa0   :  { %v214_v12 = vsel %vm210_vm4, %v198_v3, %v213_v9  ;;  %v217_v13 = vsel %vm211_vm5, %v204_v6, 920167782  ;;  %v221_v14 = vsel %vm211_vm5, %v207_v7, 1326507024  ;;  %v92_v19 = vshll.u32 %v370_v51, %v86_v50 }
  0xa1   :  { %v218_v16 = vsel %vm210_vm4, %v201_v4, %v217_v13  ;;  %v222_v17 = vsel %vm210_vm4, %v204_v6, %v221_v14  ;;  %v215_v20 = vsel %vm209_vm3, %v212_v8, %v214_v12  ;;  %v93_v23 = vshrl.u32 %v371_v53, %v87_v5 }
  0xa2   :  { %v219_v21 = vsel %vm209_vm3, %v216_v10, %v218_v16  ;;  %v223_v22 = vsel %vm209_vm3, %v220_v11, %v222_v17  ;;  %v91_v31 = vor.u32 %v90_v18, %v89_v15  ;;  %v95_v34 = vshll.u32 %v371_v53, %v86_v50 }
  0xa3   :  { %v437_v24 = vmul.u32.u64.low %v425_v44, %v223_v22  ;;  %v438_v28 = vmul.u32.u64.high %v425_v44, %v223_v22, %v437_v24  ;;  %v441_v29 = vmul.u32.u64.low %v425_v44, %v219_v21  ;;  %v442_v30 = vmul.u32.u64.high %v425_v44, %v219_v21, %v441_v29 }
  0xa4   :  { %v94_v33 = vor.u32 %v93_v23, %v92_v19  ;;  %v96_v35 = vshrl.u32 %v372_v55, %v87_v5  ;;  %v98_v36 = vshll.u32 %v372_v55, %v86_v50  ;;  %v99_v37 = vshrl.u32 %v373_v57, %v87_v5 }
  0xa5   :  { %v102_v38 = vshrl.u32 %v374_v0, %v87_v5  ;;  %v231_v40 = vmul.u32 %v425_v44, %v215_v20  ;;  %v88_v41 = vshrl.u32 %v369_v47, %v87_v5  ;;  %v101_v43 = vshll.u32 %v373_v57, %v86_v50 }
  0xa6   :  { %v97_v42 = vor.u32 %v96_v35, %v95_v34  ;;  %vm233_vm6 = vc.u32 %v438_v28, %v441_v29  ;;  %v234_v46 = vadd.s32 1, %v442_v30  ;;  %v100_v48 = vor.u32 %v99_v37, %v98_v36 }
  0xa7   :  { %vm104_vm7 = vcmp.lt.s32.totalorder %v428_v49, 1  ;;  %v103_v51 = vor.u32 %v102_v38, %v101_v43  ;;  %vm106_vm8 = vcmp.lt.s32.totalorder %v428_v49, 3  ;;  %vm107_vm9 = vcmp.lt.s32.totalorder %v428_v49, 4 }
  0xa8   :  { %v112_v52 = vsel %vm104_vm7, %v91_v31, %v94_v33  ;;  %v235_v45 = vsel %vm233_vm6, %v234_v46, %v442_v30  ;;  %v109_v53 = vsel %vm107_vm9, %v97_v42, 2102212464  ;;  %v113_v44 = vsel %vm107_vm9, %v100_v48, 920167782 }
  0xa9   :  { %v116_v47 = vsel %vm104_vm7, %v94_v33, %v97_v42  ;;  %v236_v54 = vadd.s32 %v235_v45, %v231_v40  ;;  %vm105_vm10 = vcmp.lt.s32.totalorder %v428_v49, 2  ;;  %v114_v50 = vsel %vm106_vm8, %v97_v42, %v113_v44 }
  0xaa   :  { %v117_v55 = vsel %vm107_vm9, %v103_v51, 1326507024  ;;  %v108_v56 = vsel %vm104_vm7, %v88_v41, %v91_v31  ;;  %v110_v57 = vsel %vm106_vm8, %v94_v33, %v109_v53  ;;  %v115_v58 = vsel %vm105_vm10, %v112_v52, %v114_v50 }
  0xab   :  { %v118_v59 = vsel %vm106_vm8, %v100_v48, %v117_v55  ;;  %v237_v60 = vadd.s32 536870912, %v236_v54  ;;  %v452_v62 = vmul.u32.u64.low %v120_v39, %v115_v58  ;;  %v453_v63 = vmul.u32.u64.high %v120_v39, %v115_v58, %v452_v62 }
  0xac   :  { %v119_v61 = vsel %vm105_vm10, %v116_v47, %v118_v59  ;;  %v111_v3 = vsel %vm105_vm10, %v108_v56, %v110_v57  ;;  %v232_v19 = vadd.s32 %v441_v29, %v438_v28  ;;  %vm282_vm5 = vcmask 388096  }
  0xad   :  { %v455_v0 = vmul.u32.u64.low %v120_v39, %v119_v61  ;;  %v456_v1 = vmul.u32.u64.high %v120_v39, %v119_v61, %v455_v0  ;;  %v238_v2 = vshrl.u32 %v237_v60, 30  ;;  %v130_v5 = vadd.s32 1, %v453_v63 }
  0xae   :  { %v127_v49 = vmul.u32 %v120_v39, %v111_v3  ;;  %vm268_vm6 = vweird.f32 %v411_v25  ;;  %vm280_vm10 = vcmask 392192  }
  0xaf   :  { %v239_v4 = vshll.u32 %v238_v2, 30  ;;  %vm129_vm11 = vc.u32 %v456_v1, %v452_v62  ;;  %v128_v40 = vadd.s32 %v452_v62, %v456_v1  ;;  %v262_v45 = vsub.s32 4, %v238_v2 }
  0xb0   :  { %v131_v7 = vsel %vm129_vm11, %v130_v5, %v453_v63  ;;  %vm164_vm11 = vweird.f32 %v413_v26 }
  0xb1   :  { %v240_v6 = vsub.s32 %v236_v54, %v239_v4  ;;  %v132_v8 = vadd.s32 %v131_v7, %v127_v49  ;;  %v263_v56 = vsel %vm178_vm14, %v262_v45, %v238_v2 }
  0xb2   :  { %v265_v58 = vsel %vm466_vm15, 0, %v263_v56 }
  0xb3   :  { %v242_v9 = vsub.s32 0, %v240_v6  ;;  %v133_v10 = vadd.s32 536870912, %v132_v8  ;;  %v269_v61 = vadd.s32 3, %v265_v58 }
  0xb5   :  { %v309_v11 = vmin.u32 %v242_v9, %v240_v6  ;;  %v134_v12 = vshrl.u32 %v133_v10, 30  ;;  %v270_v0 = vand.u32 3, %v269_v61 }
  0xb7   :  { %v244_v13 = vclz %v309_v11  ;;  %v135_v14 = vshll.u32 %v134_v12, 30  ;;  %v158_v27 = vsub.s32 4, %v134_v12  ;;  %vm275_vm2 = vcmp.eq.s32.totalorder %v270_v0, 2 }
  0xb8   :  { %vm272_vm3 = vcmp.eq.s32.totalorder %v270_v0, 0  ;;  %vm271_vm4 = vcmp.lt.s32.totalorder %v270_v0, 2 }
  0xb9   :  { %v310_v15 = vadd.s32 4294967294, %v244_v13  ;;  %v136_v16 = vsub.s32 %v132_v8, %v135_v14  ;;  %v159_v63 = vsel %vm74_vm0, %v158_v27, %v134_v12 }
  0xba   :  { %v161_v2 = vsel %vm73_vm1, 0, %v159_v63 }
  0xbb   :  { %vm311_vm12 = vcmp.lt.s32.totalorder %v310_v15, 0  ;;  %v138_v18 = vsub.s32 0, %v136_v16  ;;  %v165_v49 = vadd.s32 3, %v161_v2 }
  0xbc   :  { %v247_v17 = vsel %vm311_vm12, 0, %v310_v15 }
  0xbd   :  { %v248_v20 = vsub.s32 32, %v247_v17  ;;  %v252_v21 = vsub.s32 4294967266, %v247_v17  ;;  %v305_v22 = vmin.u32 %v138_v18, %v136_v16  ;;  %v249_v23 = vshll.u32 %v240_v6, %v247_v17 }
  0xbe   :  { %v166_v9 = vand.u32 3, %v165_v49 }
  0xbf   :  { %v250_v24 = vshrl.u32 %v232_v19, %v248_v20  ;;  %v253_v30 = vadd.s32 127, %v252_v21  ;;  %v140_v31 = vclz %v305_v22 }
  0xc0   :  { %vm171_vm7 = vcmp.eq.s32.totalorder %v166_v9, 2  ;;  %vm168_vm8 = vcmp.eq.s32.totalorder %v166_v9, 0  ;;  %vm167_vm9 = vcmp.lt.s32.totalorder %v166_v9, 2 }
  0xc1   :  { %v251_v33 = vor.u32 %v250_v24, %v249_v23  ;;  %v254_v34 = vshll.u32 %v253_v30, 23  ;;  %v306_v35 = vadd.s32 4294967294, %v140_v31 }
  0xc3   :  { %v255_v36 = vor.u32 4788187, %v254_v34  ;;  %vm307_vm13 = vcmp.lt.s32.totalorder %v306_v35, 0  ;;  %v258_v38 = vcvt.s32.f32 %v251_v33 }
  0xc4   :  { %v143_v39 = vsel %vm307_vm13, 0, %v306_v35 }
  0xc5   :  { %v256_v37 = vand.u32 2147483647, %v255_v36  ;;  %v144_v41 = vsub.s32 32, %v143_v39  ;;  %v148_v42 = vsub.s32 4294967266, %v143_v39  ;;  %v145_v29 = vshll.u32 %v136_v16, %v143_v39 }
  0xc7   :  { %v259_v28 = vmul.f32 %v258_v38, %v256_v37  ;;  %v146_v43 = vshrl.u32 %v128_v40, %v144_v41  ;;  %v149_v46 = vadd.s32 127, %v148_v42 }
  0xc9   :  { %v260_v48 = vxor.u32 2147483648, %v259_v28  ;;  %v147_v51 = vor.u32 %v146_v43, %v145_v29  ;;  %v150_v52 = vshll.u32 %v149_v46, 23 }
  0xcb   :  { %v261_v44 = vsel %vm178_vm14, %v260_v48, %v259_v28  ;;  %v151_v54 = vor.u32 4788187, %v150_v52  ;;  %v154_v55 = vcvt.s32.f32 %v147_v51 }
  0xcc   :  { %v264_v47 = vsel %vm466_vm15, %v411_v25, %v261_v44 }
  0xcd   :  { %336 = vcosq.f32 %v264_v47  ;;  %v152_v50 = vand.u32 2147483647, %v151_v54 }
  0xce   :  { %338 = vsinq.f32 %v264_v47 }
  0xcf   :  { %v155_v57 = vmul.f32 %v154_v55, %v152_v50 }
  0xd1   :  { %v156_v59 = vxor.u32 2147483648, %v155_v57 }
  0xd3   :  { %v157_v60 = vsel %vm74_vm0, %v156_v59, %v155_v57 }
  0xd4   :  { %v160_v62 = vsel %vm73_vm1, %v413_v26, %v157_v60 }
  0xd5   :  { %340 = vcosq.f32 %v160_v62 }
  0xd6   :  { %342 = vsinq.f32 %v160_v62 }
  0xda   :  { %v337_v1 = vpop.eup %336 }
  0xdb   :  { %v339_v3 = vpop.eup %338  ;;  %v276_v4 = vxor.u32 2147483648, %v337_v1 }
  0xdc   :  { %v273_v5 = vxor.u32 2147483648, %v339_v3 }
  0xdd   :  { %v277_v6 = vsel %vm275_vm2, %v276_v4, %v339_v3 }
  0xde   :  { %v274_v7 = vsel %vm272_vm3, %v337_v1, %v273_v5 }
  0xdf   :  { %v278_v32 = vsel %vm271_vm4, %v274_v7, %v277_v6 }
  0xe0   :  { %v279_v8 = vsel %vm268_vm6, nan, %v278_v32 }
  0xe1   :  { %283 = vst.msk [vmem:[#allocation2 + $0x8] sm:$0xf] %vm282_vm5, %v279_v8 }
  0xe2   :  { %v341_v10 = vpop.eup %340 }
  0xe3   :  { %v343_v11 = vpop.eup %342  ;;  %v172_v12 = vxor.u32 2147483648, %v341_v10 }
  0xe4   :  { %v169_v13 = vxor.u32 2147483648, %v343_v11 }
  0xe5   :  { %v173_v14 = vsel %vm171_vm7, %v172_v12, %v343_v11 }
  0xe6   :  { %v170_v15 = vsel %vm168_vm8, %v341_v10, %v169_v13 }
  0xe7   :  { %v174_v16 = vsel %vm167_vm9, %v170_v15, %v173_v14 }
  0xe8   :  { %v175_v25 = vsel %vm164_vm11, nan, %v174_v16 }
  0xe9   :  { %281 = vst.msk [vmem:[#allocation2] sm:$0xff] %vm280_vm10, %v175_v25 }
  0xea   :  { %355 = shalt.err (!%p352_p4)
}
  0xeb   :  { %s376_s22 = smov 128   ;;  %s377_s23 = smov 8  }
  0xec   :  { %295 = dma.vmem_to_hbm [thread:$0]  %s290_s20, 256, %s486_s2, [#allocation3], %s376_s22, %s376_s22, %s377_s23  }
  0xed   :  { %364 = dma.done.wait [#allocation3], 256  }
  0xee   :  { %365 = vsyncadd [#allocation3], 4294967040 }
  0xef   :  { %299 = vsyncpa [#allocation3], 1 }

</bundles_post_ra>
